<compile_context>
chip_gen: v7x
topology: tpu7x:2x2x1
jax: 0.10.0
libtpu: 0.0.40
codegen_flags: <defaults>
</compile_context>

<pallas_src>
import math

import jax
import jax.numpy as jnp
from jax.experimental import pallas as pl
from jax.experimental.pallas import tpu as pltpu


# ---------------------------------------------------------------------------
# Kernels (pure elementwise, 2-D lane-dense blocks)
# ---------------------------------------------------------------------------
def _pe_add_kernel(x_ref, pe_ref, o_ref):
    # x_ref: (BN, FT); pe_ref: (1, FT) broadcasts over the batch rows.
    o_ref[...] = x_ref[...] + pe_ref[...]


def _pe_add_dropout_kernel(x_ref, pe_ref, scale_ref, o_ref):
    # scale_ref holds 0 (dropped) or 1/(1-p) (kept), already in x.dtype.
    o_ref[...] = (x_ref[...] + pe_ref[...]) * scale_ref[...]


# ---------------------------------------------------------------------------
# Parameter ("buffer") setup — mirrors PositionalEncoding.__init__
# ---------------------------------------------------------------------------
def build_pe_table(d_model: int, max_len: int) -> jnp.ndarray:
    if d_model % 2 != 0:
        raise ValueError(
            f"Cannot use sin/cos positional encoding with odd dim (got dim={d_model})")
    position = jnp.arange(max_len, dtype=jnp.float32)[:, None]                 # (max_len, 1)
    div_term = jnp.exp(jnp.arange(0, d_model, 2, dtype=jnp.float32)
                       * (-math.log(10000.0) / d_model))                       # (d_model//2,)
    angles = position * div_term                                               # (max_len, d_model//2)
    pe = jnp.zeros((max_len, d_model), dtype=jnp.float32)
    pe = pe.at[:, 0::2].set(jnp.sin(angles))
    pe = pe.at[:, 1::2].set(jnp.cos(angles))
    return pe   # 2-D view of the PyTorch buffer pe[:, 0, :]


# ---------------------------------------------------------------------------
# Tiling helper: lane-dense feature tiles of ~1 MiB per block
# ---------------------------------------------------------------------------
def _choose_tiles(N: int, F: int, itemsize: int):
    # Batch tile: must be divisible by 8 or equal the full batch dim.
    BN = 8 if (N >= 8 and N % 8 == 0) else N
    # Feature tile: multiple of 128 that divides F, sized so BN*FT*itemsize ~ 1 MiB.
    target_elems = max(128, (1 << 20) // max(1, itemsize * BN))
    if F % 128 != 0 or F <= 128:
        return BN, F
    FT = 128
    cand = 128
    limit = min(F, target_elems)
    while cand <= limit:
        if F % cand == 0:
            FT = cand
        cand += 128
    return BN, FT


# ---------------------------------------------------------------------------
# Forward wrapper
# ---------------------------------------------------------------------------
def positional_encoding_forward(x, pe2d, *, dropout_p=0.1, training=False, seed=0):
    """x: [N, T, C]; pe2d: [max_len, C] (float32 table). Returns [N, T, C]."""
    N, T, C = x.shape
    F = T * C
    itemsize = jnp.dtype(x.dtype).itemsize

    # pe in x.dtype (no f32 upcast -> smaller DMA / VMEM footprint for bf16).
    pe_flat = pe2d[:T].astype(x.dtype).reshape(1, F)
    x2 = x.reshape(N, F)

    BN, FT = _choose_tiles(N, F, itemsize)
    grid = (pl.cdiv(N, BN), pl.cdiv(F, FT))

    x_spec = pl.BlockSpec((BN, FT), lambda i, j: (i, j))
    pe_spec = pl.BlockSpec((1, FT), lambda i, j: (0, j))
    out_spec = pl.BlockSpec((BN, FT), lambda i, j: (i, j))
    out_shape = jax.ShapeDtypeStruct((N, F), x.dtype)
    compiler_params = pltpu.CompilerParams(
        dimension_semantics=("parallel", "parallel"))

    use_dropout = training and dropout_p > 0.0
    if not use_dropout:
        cost = pl.CostEstimate(
            flops=N * F, transcendentals=0,
            bytes_accessed=(2 * N * F + F) * itemsize)
        out2 = pl.pallas_call(
            _pe_add_kernel,
            out_shape=out_shape,
            grid=grid,
            in_specs=[x_spec, pe_spec],
            out_specs=out_spec,
            compiler_params=compiler_params,
            cost_estimate=cost,
        )(x2, pe_flat)
        return out2.reshape(N, T, C)

    if not (0.0 < dropout_p < 1.0):
        raise ValueError(f"dropout_p must be in [0, 1) for the training path, got {dropout_p}")

    # Inverted-dropout keep/scale mask, generated with the JAX PRNG in the wrapper.
    key = jax.random.PRNGKey(seed)
    keep = jax.random.bernoulli(key, 1.0 - dropout_p, (N, F))
    scale = (keep.astype(jnp.float32) * (1.0 / (1.0 - dropout_p))).astype(x.dtype)

    cost = pl.CostEstimate(
        flops=2 * N * F, transcendentals=0,
        bytes_accessed=(3 * N * F + F) * itemsize)
    out2 = pl.pallas_call(
        _pe_add_dropout_kernel,
        out_shape=out_shape,
        grid=grid,
        in_specs=[x_spec, pe_spec, x_spec],
        out_specs=out_spec,
        compiler_params=compiler_params,
        cost_estimate=cost,
    )(x2, pe_flat, scale)
    return out2.reshape(N, T, C), scale.reshape(N, T, C)


# ---------------------------------------------------------------------------
# Test
# ---------------------------------------------------------------------------
if __name__ == "__main__":
    N, T, C = 2, 8, 32          # batch, seq, d_model
    MAX_LEN = 64
    DROPOUT_P = 0.1

    key = jax.random.PRNGKey(0)
    x = jax.random.normal(key, (N, T, C), dtype=jnp.float32)
    pe2d = build_pe_table(C, MAX_LEN)

    # --- eval path (dropout = identity), verified against pure-JAX reference ---
    out_eval = positional_encoding_forward(x, pe2d, dropout_p=DROPOUT_P, training=False)
    out_eval = jax.block_until_ready(out_eval)
    ref = x + pe2d[:T][None, :, :]
    assert out_eval.shape == (N, T, C)
    assert jnp.allclose(out_eval, ref, atol=1e-5, rtol=1e-5), "eval-path mismatch vs reference"

    # --- training path (inverted dropout) ---
    out_train, scale = positional_encoding_forward(
        x, pe2d, dropout_p=DROPOUT_P, training=True, seed=123)
    out_train = jax.block_until_ready(out_train)
    assert out_train.shape == (N, T, C)
    # Exact check against the same mask applied in pure JAX.
    ref_train = (x + pe2d[:T][None, :, :]).astype(x.dtype) * scale
    assert jnp.allclose(out_train, ref_train, atol=1e-5, rtol=1e-5), \
        "training-path mismatch vs masked reference"
    # Dropout invariant: every kept element equals (x + pe) / (1 - p).
    kept = scale != 0.0
    scaled_ref = ref / (1.0 - DROPOUT_P)
    assert jnp.allclose(jnp.where(kept, out_train, 0.0),
                        jnp.where(kept, scaled_ref, 0.0),
                        atol=1e-4, rtol=1e-4), "kept elements must equal (x+pe)/(1-p)"

    print("KERNEL_OK")
</pallas_src>

<mosaic_0001>
module attributes {stable_mosaic.version = 11 : i64} {
  func.func @_pe_add_kernel(%arg0: i32, %arg1: i32, %arg2: memref<2x256xf32, #tpu.memory_space<vmem>>, %arg3: memref<1x256xf32, #tpu.memory_space<vmem>>, %arg4: memref<2x256xf32, #tpu.memory_space<vmem>>) attributes {dimension_semantics = [#tpu.dimension_semantics<parallel>, #tpu.dimension_semantics<parallel>], iteration_bounds = array<i64: 1, 1>, scalar_prefetch = 0 : i64, scratch_operands = 0 : i64, tpu.core_type = #tpu.core_type<tc>, window_params = [{transform_indices = @transform_0, window_bounds = array<i64: 2, 256>}, {transform_indices = @transform_1, window_bounds = array<i64: 1, 256>}, {transform_indices = @transform_2, window_bounds = array<i64: 2, 256>}]} {
    %c0 = arith.constant 0 : index
    %c0_0 = arith.constant 0 : index
    %0 = vector.load %arg2[%c0, %c0_0] : memref<2x256xf32, #tpu.memory_space<vmem>>, vector<2x256xf32>
    %c0_1 = arith.constant 0 : index
    %c0_2 = arith.constant 0 : index
    %1 = vector.load %arg3[%c0_1, %c0_2] : memref<1x256xf32, #tpu.memory_space<vmem>>, vector<1x256xf32>
    %2 = vector.broadcast %1 : vector<1x256xf32> to vector<2x256xf32>
    %3 = arith.addf %0, %2 : vector<2x256xf32>
    %c0_3 = arith.constant 0 : index
    %c0_4 = arith.constant 0 : index
    %4 = vector.load %arg4[%c0_3, %c0_4] : memref<2x256xf32, #tpu.memory_space<vmem>>, vector<2x256xf32>
    tpu.vector_store %arg4[%c0_3, %c0_4], %3 {strides = array<i32>} : memref<2x256xf32, #tpu.memory_space<vmem>>, vector<2x256xf32>,
    return
  }
  func.func @transform_0(%arg0: i32, %arg1: i32) -> (i32, i32) {
    %c0_i32 = arith.constant 0 : i32
    return %arg0, %arg1 : i32, i32
  }
  func.func @transform_1(%arg0: i32, %arg1: i32) -> (i32, i32) {
    %c0_i32 = arith.constant 0 : i32
    %c0_i32_0 = arith.constant 0 : i32
    return %c0_i32, %arg1 : i32, i32
  }
  func.func @transform_2(%arg0: i32, %arg1: i32) -> (i32, i32) {
    %c0_i32 = arith.constant 0 : i32
    return %arg0, %arg1 : i32, i32
  }
}

</mosaic_0001>

<bundles_post_ra>
// kernel: tpu_custom_call.1
= control target key start
LH: loop header
LB: loop body
LE: loop exit
PB: predicated region body
PF: predicated region fallthrough
CT: control target
= control target key end

     0   :  { %7 = vsyncpa [#allocation3], 0  ;;  %s157_s0 = inlined_call_operand.hbm [shape: f32[2,256], index: 0, kind: input, shape index: {}]   ;;  %s158_s1 = inlined_call_operand.vmem [shape: f32[1,256], index: 1, kind: input, shape index: {}]   ;;  %s159_s2 = inlined_call_operand.hbm [shape: f32[2,256], index: 2, kind: output, shape index: {}]  }
   0x1   :  { %8 = vsyncpa [#allocation4], 0  ;;  %s112_s9 = smov [#allocation2]   ;;  %s64_s13 = scalar_lea.hbm %s157_s0, 64 }
   0x2   :  { %s15_s10 = sshll.u32 %s112_s9, 4  ;;  %p65_p0 = scmp.ne.s32.totalorder %s157_s0, %s64_s13  ;;  %s16_s10 = int_to_ptr.vmem [resolvable:$true] %s15_s10 }
   0x3   :  { %p68_p1 = scmp.lt.u32.totalorder %s64_s13, %s157_s0 }
   0x5   :  { %p70_p2 = pnand %p68_p1, %p65_p0 }
   0x7   :  { %73 = shalt.err (!%p70_p2)
}
   0x8   :  { %s74_s18 = scalar_lea.vmem %s16_s10, 64  ;;  %p79_p4 = scmp.lt.s32.totalorder %s16_s10, %s16_s10 }
   0x9   :  { %p75_p3 = scmp.ne.s32.totalorder %s16_s10, %s74_s18  ;;  %p80_p5 = scmp.lt.s32.totalorder %s74_s18, %s74_s18 }
   0xb   :  { %p81_p6 = por %p80_p5, %p79_p4 }
   0xd   :  { %p82_p7 = pnand %p81_p6, %p75_p3 }
   0xf   :  { %85 = shalt.err (!%p82_p7)
}
  0x10   :  { %18 = dma.hbm_to_vmem [thread:$0]  %s157_s0, 64, %s16_s10, [#allocation3]  }
  0x11   :  { %108 = dma.done.wait [#allocation3], 64  }
  0x12   :  { %109 = vsyncadd [#allocation3], 4294967232  ;;  %v27_v0 = vlaneseq  ;;  %v113_v1 = vmov 1983009808   ;;  %v25_v7 = vld [vmem:[%s158_s1] sm:$0x3] }
  0x13   :  { %v37_v2 = vunpack.c.l.s4 %v113_v1  ;;  %v24_v12 = vld [vmem:[#allocation2] sm:$0xf]  ;;  %s114_s23 = smov [#allocation5]  }
  0x14   :  { %v28_v3 = vshrl.u32 %v27_v0, 7  ;;  %s52_s0 = sshll.u32 %s114_s23, 4  ;;  %s53_s0 = int_to_ptr.vmem [resolvable:$true] %s52_s0 }
  0x15   :  { %v38_v6 = vunpack.c.0.s8 %v37_v2  ;;  %s86_s24 = scalar_lea.vmem %s53_s0, 64  ;;  %p91_p9 = scmp.lt.s32.totalorder %s53_s0, %s53_s0 }
  0x16   :  { %v29_v4 = vsub.s32 0, %v28_v3  ;;  %v33_v5 = vsub.s32 1, %v28_v3  ;;  %p87_p8 = scmp.ne.s32.totalorder %s53_s0, %s86_s24  ;;  %p92_p10 = scmp.lt.s32.totalorder %s86_s24, %s86_s24 }
  0x17   :  { %v41_v10 = vsub.s32 %v38_v6, %v28_v3 }
  0x18   :  { %v30_v8 = vrot.slane %v25_v7, %v29_v4  ;;  %v34_v9 = vrot.slane %v25_v7, %v33_v5  ;;  %p93_p11 = por %p92_p10, %p91_p9 }
  0x1a   :  { %v35_v11 = vcombine.low %v30_v8, %v34_v9  ;;  %p94_p12 = pnand %p93_p11, %p87_p8 }
  0x1c   :  { %v42_v13 = vrot.slane %v35_v11, %v41_v10 }
  0x1e   :  { %v44_v14 = vadd.f32 %v42_v13, %v24_v12 }
  0x20   :  { %45 = vst [vmem:[#allocation5] sm:$0xf] %v44_v14 }
  0x21   :  { %97 = shalt.err (!%p94_p12)
}
  0x22   :  { %s98_s26 = scalar_lea.hbm %s159_s2, 64 }
  0x23   :  { %p99_p13 = scmp.ne.s32.totalorder %s159_s2, %s98_s26  ;;  %p102_p0 = scmp.lt.u32.totalorder %s98_s26, %s159_s2 }
  0x25   :  { %p104_p1 = pnand %p102_p0, %p99_p13 }
  0x27   :  { %107 = shalt.err (!%p104_p1)
}
  0x28   :  { %55 = dma.vmem_to_hbm [thread:$0]  %s53_s0, 64, %s159_s2, [#allocation4]  }
  0x29   :  { %110 = dma.done.wait [#allocation4], 64  }
  0x2a   :  { %111 = vsyncadd [#allocation4], 4294967232 }
  0x2b   :  { %59 = vsyncpa [#allocation3], 1 }
  0x2c   :  { %60 = vsyncpa [#allocation4], 1 }

</bundles_post_ra>
